<compile_context>
chip_gen: v6e
topology: v6e:2x2x1
jax: 0.10.0
libtpu: 0.0.40
codegen_flags: <defaults>
</compile_context>

<pallas_src>
import functools

import jax
import jax.numpy as jnp
from jax.experimental import pallas as pl
from jax.experimental.pallas import tpu as pltpu


def cell_kernel(w_ref, x_ref, pc_ref, wt_ref, b_ref, out_ref, *, N, C, H, W):
    """Fullpool supernet cell + GAP + linear head.

    w_ref   : (24,)         SMEM  softmax(alphas_normal) flattened (scalar reads)
    x_ref   : (N*C, H*W)    VMEM  lane-dense flattened input (row = one (n,c) map)
    pc_ref  : (9, N*C, H*W) VMEM  position-only pooling constants:
                                  0..3 mul masks (L,R,U,D) for the avg sums,
                                  4..7 add masks (0 / -inf) for the maxes,
                                  8    exact 1/count (count_include_pad=False)
    wt_ref  : (4, C, NCp)   VMEM  per-state classifier blocks, pre-scaled by 1/(H*W)
    b_ref   : (1, NCp)      VMEM  classifier bias (zero padded to 128 lanes)
    out_ref : (N, NCp)      VMEM  padded logits
    """
    L = H * W
    x = x_ref[...]
    NCp = wt_ref.shape[2]

    def pools(a):
        """3x3 / stride 1 / pad 1 avg & max pool, separable (1x3 then 3x1)."""
        # horizontal 1x3 pass: 2 rolls shared between the sum and the max
        vl = pltpu.roll(a, shift=1, axis=1)          # a[h, w-1]
        vr = pltpu.roll(a, shift=L - 1, axis=1)      # a[h, w+1]
        hs = a + vl * pc_ref[0] + vr * pc_ref[1]
        hm = jnp.maximum(a, jnp.maximum(vl + pc_ref[4], vr + pc_ref[5]))
        # vertical 3x1 pass on the horizontal partials
        su = pltpu.roll(hs, shift=W, axis=1)         # hs[h-1, w]
        sd = pltpu.roll(hs, shift=L - W, axis=1)     # hs[h+1, w]
        avg = (hs + su * pc_ref[2] + sd * pc_ref[3]) * pc_ref[8]
        mu = pltpu.roll(hm, shift=W, axis=1)
        md = pltpu.roll(hm, shift=L - W, axis=1)
        mx = jnp.maximum(hm, jnp.maximum(mu + pc_ref[6], md + pc_ref[7]))
        return avg, mx

    def edge(e, s, avg, mx):
        # PRIMITIVES = ['none', 'skip_connect', 'avg_pool_3x3', 'max_pool_3x3']
        # 'none' contributes zero -> omitted.
        return w_ref[4 * e + 1] * s + w_ref[4 * e + 2] * avg + w_ref[4 * e + 3] * mx

    # Pools computed once per distinct state and reused across all its edges.
    s0 = x
    a0, m0 = pools(s0)
    s1 = edge(0, s0, a0, m0)
    a1, m1 = pools(s1)
    s2 = edge(1, s0, a0, m0) + edge(2, s1, a1, m1)
    a2, m2 = pools(s2)
    s3 = edge(3, s0, a0, m0) + edge(4, s1, a1, m1) + edge(5, s2, a2, m2)

    # ---- concat(s0..s3) -> GAP -> linear head (no MXU, no sel matmul) ------
    # logits[n] = bias + sum_i sum_c mean(s_i[n,c,:,:]) * W_i[c, :]
    rowsums = [jnp.sum(s, axis=1, keepdims=True) for s in (s0, s1, s2, s3)]  # (N*C, 1)
    rows = []
    for n in range(N):                                   # N is tiny & static
        acc = jnp.zeros((C, NCp), jnp.float32)
        for i in range(4):
            acc = acc + rowsums[i][n * C:(n + 1) * C, :] * wt_ref[i]
        rows.append(jnp.sum(acc, axis=0, keepdims=True))  # sublane reduce -> (1, NCp)
    out_ref[...] = b_ref[...] + jnp.concatenate(rows, axis=0)


@jax.jit
def supernet_forward(x, alphas, fc_w_t, fc_b):
    N, C, H, W = x.shape
    L = H * W
    num_classes = fc_w_t.shape[1]
    NCp = max(128, ((num_classes + 127) // 128) * 128)      # lane-aligned output

    # weights = F.softmax(alphas_normal, dim=-1): 24 floats -> plain JAX,
    # flattened so the SMEM buffer is 1-D (2-D SMEM pads to 8x128 words).
    weights = jax.nn.softmax(alphas.astype(jnp.float32), axis=-1).reshape(-1)

    # Lane-dense layout for the cell: (N, C, H, W) -> (N*C, H*W).
    x_flat = x.astype(jnp.float32).reshape(N * C, L)

    # ---- position-only pooling constants (constant-folded by XLA under jit) ----
    ww = jnp.arange(L, dtype=jnp.int32) % W
    hh = jnp.arange(L, dtype=jnp.int32) // W
    vL = ww >= 1
    vR = ww <= W - 2
    vU = hh >= 1
    vD = hh <= H - 2
    cnt = (1 + vL.astype(jnp.int32) + vR.astype(jnp.int32)) * \
          (1 + vU.astype(jnp.int32) + vD.astype(jnp.int32))
    inv_cnt = 1.0 / cnt.astype(jnp.float32)                 # exact {1/4, 1/6, 1/9}
    mul = lambda v: v.astype(jnp.float32)
    add = lambda v: jnp.where(v, 0.0, -jnp.inf).astype(jnp.float32)
    pc = jnp.stack([mul(vL), mul(vR), mul(vU), mul(vD),
                    add(vL), add(vR), add(vU), add(vD),
                    inv_cnt], axis=0)                        # (9, L)
    pc = jnp.broadcast_to(pc[:, None, :], (9, N * C, L))     # (9, N*C, L)

    # Classifier prep: per-state weight blocks, GAP's 1/L folded in, lane padded.
    w_states = fc_w_t.astype(jnp.float32).reshape(4, C, num_classes) / jnp.float32(L)
    w_states = jnp.pad(w_states, ((0, 0), (0, 0), (0, NCp - num_classes)))
    b_pad = jnp.pad(fc_b.astype(jnp.float32).reshape(1, num_classes),
                    ((0, 0), (0, NCp - num_classes)))

    kernel = functools.partial(cell_kernel, N=N, C=C, H=H, W=W)
    logits_pad = pl.pallas_call(
        kernel,
        out_shape=jax.ShapeDtypeStruct((N, NCp), jnp.float32),
        in_specs=[
            pl.BlockSpec(memory_space=pltpu.MemorySpace.SMEM),   # arch weights (24,)
            pl.BlockSpec(memory_space=pltpu.MemorySpace.VMEM),   # x (flattened)
            pl.BlockSpec(memory_space=pltpu.MemorySpace.VMEM),   # pooling constants
            pl.BlockSpec(memory_space=pltpu.MemorySpace.VMEM),   # classifier W blocks
            pl.BlockSpec(memory_space=pltpu.MemorySpace.VMEM),   # classifier bias
        ],
        out_specs=pl.BlockSpec(memory_space=pltpu.MemorySpace.VMEM),
    )(weights, x_flat, pc, w_states, b_pad)
    return logits_pad[:, :num_classes]


if __name__ == "__main__":
    NUM_CLASSES = 10
    STEPS = 3
    NUM_OPS = 4                              # ['none','skip','avg_pool_3x3','max_pool_3x3']
    K = sum(1 + i for i in range(STEPS))     # = 6 edges
    N, C, H, W = 2, 4, 16, 16

    key = jax.random.PRNGKey(0)
    kx, ka, kw, kb = jax.random.split(key, 4)

    x = jax.random.normal(kx, (N, C, H, W), dtype=jnp.float32)
    # alphas_normal = 0.001 * randn(k, num_ops)
    alphas = 0.001 * jax.random.normal(ka, (K, NUM_OPS), dtype=jnp.float32)
    # classifier params (deterministic synthetic init), stored pre-transposed
    fc_w_t = 0.05 * jax.random.normal(kw, (4 * C, NUM_CLASSES), dtype=jnp.float32)
    fc_b = 0.01 * jax.random.normal(kb, (1, NUM_CLASSES), dtype=jnp.float32)

    logits = supernet_forward(x, alphas, fc_w_t, fc_b)
    jax.block_until_ready(logits)
    assert logits.shape == (N, NUM_CLASSES)
    assert bool(jnp.all(jnp.isfinite(logits)))
    print("KERNEL_OK")
</pallas_src>

<mosaic_0001>
module attributes {stable_mosaic.version = 11 : i64} {
  func.func @cell_kernel(%arg0: memref<24xf32, #tpu.memory_space<smem>>, %arg1: memref<8x256xf32, #tpu.memory_space<vmem>>, %arg2: memref<9x8x256xf32, #tpu.memory_space<vmem>>, %arg3: memref<4x4x128xf32, #tpu.memory_space<vmem>>, %arg4: memref<1x128xf32, #tpu.memory_space<vmem>>, %arg5: memref<2x128xf32, #tpu.memory_space<vmem>>) attributes {dimension_semantics = [], scalar_prefetch = 0 : i64, scratch_operands = 0 : i64, tpu.core_type = #tpu.core_type<tc>} {
    %c0 = arith.constant 0 : index
    %c0_0 = arith.constant 0 : index
    %0 = vector.load %arg1[%c0, %c0_0] : memref<8x256xf32, #tpu.memory_space<vmem>>, vector<8x256xf32>
    %c1_i32 = arith.constant 1 : i32
    %1 = tpu.dynamic_rotate %0 by %c1_i32 dim 1 : vector<8x256xf32>, i32 -> vector<8x256xf32>
    %c255_i32 = arith.constant 255 : i32
    %2 = tpu.dynamic_rotate %0 by %c255_i32 dim 1 : vector<8x256xf32>, i32 -> vector<8x256xf32>
    %c0_1 = arith.constant 0 : index
    %c0_2 = arith.constant 0 : index
    %c0_3 = arith.constant 0 : index
    %3 = vector.load %arg2[%c0_1, %c0_2, %c0_3] : memref<9x8x256xf32, #tpu.memory_space<vmem>>, vector<1x8x256xf32>
    %4 = vector.shape_cast %3 : vector<1x8x256xf32> to vector<8x256xf32>
    %5 = arith.mulf %1, %4 : vector<8x256xf32>
    %6 = arith.addf %0, %5 : vector<8x256xf32>
    %c1 = arith.constant 1 : index
    %c0_4 = arith.constant 0 : index
    %c0_5 = arith.constant 0 : index
    %7 = vector.load %arg2[%c1, %c0_4, %c0_5] : memref<9x8x256xf32, #tpu.memory_space<vmem>>, vector<1x8x256xf32>
    %8 = vector.shape_cast %7 : vector<1x8x256xf32> to vector<8x256xf32>
    %9 = arith.mulf %2, %8 : vector<8x256xf32>
    %10 = arith.addf %6, %9 : vector<8x256xf32>
    %c4 = arith.constant 4 : index
    %c0_6 = arith.constant 0 : index
    %c0_7 = arith.constant 0 : index
    %11 = vector.load %arg2[%c4, %c0_6, %c0_7] : memref<9x8x256xf32, #tpu.memory_space<vmem>>, vector<1x8x256xf32>
    %12 = vector.shape_cast %11 : vector<1x8x256xf32> to vector<8x256xf32>
    %13 = arith.addf %1, %12 : vector<8x256xf32>
    %c5 = arith.constant 5 : index
    %c0_8 = arith.constant 0 : index
    %c0_9 = arith.constant 0 : index
    %14 = vector.load %arg2[%c5, %c0_8, %c0_9] : memref<9x8x256xf32, #tpu.memory_space<vmem>>, vector<1x8x256xf32>
    %15 = vector.shape_cast %14 : vector<1x8x256xf32> to vector<8x256xf32>
    %16 = arith.addf %2, %15 : vector<8x256xf32>
    %17 = arith.maximumf %13, %16 : vector<8x256xf32>
    %18 = arith.maximumf %0, %17 : vector<8x256xf32>
    %c16_i32 = arith.constant 16 : i32
    %19 = tpu.dynamic_rotate %10 by %c16_i32 dim 1 : vector<8x256xf32>, i32 -> vector<8x256xf32>
    %c240_i32 = arith.constant 240 : i32
    %20 = tpu.dynamic_rotate %10 by %c240_i32 dim 1 : vector<8x256xf32>, i32 -> vector<8x256xf32>
    %c2 = arith.constant 2 : index
    %c0_10 = arith.constant 0 : index
    %c0_11 = arith.constant 0 : index
    %21 = vector.load %arg2[%c2, %c0_10, %c0_11] : memref<9x8x256xf32, #tpu.memory_space<vmem>>, vector<1x8x256xf32>
    %22 = vector.shape_cast %21 : vector<1x8x256xf32> to vector<8x256xf32>
    %23 = arith.mulf %19, %22 : vector<8x256xf32>
    %24 = arith.addf %10, %23 : vector<8x256xf32>
    %c3 = arith.constant 3 : index
    %c0_12 = arith.constant 0 : index
    %c0_13 = arith.constant 0 : index
    %25 = vector.load %arg2[%c3, %c0_12, %c0_13] : memref<9x8x256xf32, #tpu.memory_space<vmem>>, vector<1x8x256xf32>
    %26 = vector.shape_cast %25 : vector<1x8x256xf32> to vector<8x256xf32>
    %27 = arith.mulf %20, %26 : vector<8x256xf32>
    %28 = arith.addf %24, %27 : vector<8x256xf32>
    %c8 = arith.constant 8 : index
    %c0_14 = arith.constant 0 : index
    %c0_15 = arith.constant 0 : index
    %29 = vector.load %arg2[%c8, %c0_14, %c0_15] : memref<9x8x256xf32, #tpu.memory_space<vmem>>, vector<1x8x256xf32>
    %30 = vector.shape_cast %29 : vector<1x8x256xf32> to vector<8x256xf32>
    %31 = arith.mulf %28, %30 : vector<8x256xf32>
    %c16_i32_16 = arith.constant 16 : i32
    %32 = tpu.dynamic_rotate %18 by %c16_i32_16 dim 1 : vector<8x256xf32>, i32 -> vector<8x256xf32>
    %c240_i32_17 = arith.constant 240 : i32
    %33 = tpu.dynamic_rotate %18 by %c240_i32_17 dim 1 : vector<8x256xf32>, i32 -> vector<8x256xf32>
    %c6 = arith.constant 6 : index
    %c0_18 = arith.constant 0 : index
    %c0_19 = arith.constant 0 : index
    %34 = vector.load %arg2[%c6, %c0_18, %c0_19] : memref<9x8x256xf32, #tpu.memory_space<vmem>>, vector<1x8x256xf32>
    %35 = vector.shape_cast %34 : vector<1x8x256xf32> to vector<8x256xf32>
    %36 = arith.addf %32, %35 : vector<8x256xf32>
    %c7 = arith.constant 7 : index
    %c0_20 = arith.constant 0 : index
    %c0_21 = arith.constant 0 : index
    %37 = vector.load %arg2[%c7, %c0_20, %c0_21] : memref<9x8x256xf32, #tpu.memory_space<vmem>>, vector<1x8x256xf32>
    %38 = vector.shape_cast %37 : vector<1x8x256xf32> to vector<8x256xf32>
    %39 = arith.addf %33, %38 : vector<8x256xf32>
    %40 = arith.maximumf %36, %39 : vector<8x256xf32>
    %41 = arith.maximumf %18, %40 : vector<8x256xf32>
    %c1_22 = arith.constant 1 : index
    %42 = memref.load %arg0[%c1_22] : memref<24xf32, #tpu.memory_space<smem>>
    %43 = vector.broadcast %42 : f32 to vector<8x256xf32>
    %44 = arith.mulf %43, %0 : vector<8x256xf32>
    %c2_23 = arith.constant 2 : index
    %45 = memref.load %arg0[%c2_23] : memref<24xf32, #tpu.memory_space<smem>>
    %46 = vector.broadcast %45 : f32 to vector<8x256xf32>
    %47 = arith.mulf %46, %31 : vector<8x256xf32>
    %48 = arith.addf %44, %47 : vector<8x256xf32>
    %c3_24 = arith.constant 3 : index
    %49 = memref.load %arg0[%c3_24] : memref<24xf32, #tpu.memory_space<smem>>
    %50 = vector.broadcast %49 : f32 to vector<8x256xf32>
    %51 = arith.mulf %50, %41 : vector<8x256xf32>
    %52 = arith.addf %48, %51 : vector<8x256xf32>
    %c1_i32_25 = arith.constant 1 : i32
    %53 = tpu.dynamic_rotate %52 by %c1_i32_25 dim 1 : vector<8x256xf32>, i32 -> vector<8x256xf32>
    %c255_i32_26 = arith.constant 255 : i32
    %54 = tpu.dynamic_rotate %52 by %c255_i32_26 dim 1 : vector<8x256xf32>, i32 -> vector<8x256xf32>
    %c0_27 = arith.constant 0 : index
    %c0_28 = arith.constant 0 : index
    %c0_29 = arith.constant 0 : index
    %55 = vector.load %arg2[%c0_27, %c0_28, %c0_29] : memref<9x8x256xf32, #tpu.memory_space<vmem>>, vector<1x8x256xf32>
    %56 = vector.shape_cast %55 : vector<1x8x256xf32> to vector<8x256xf32>
    %57 = arith.mulf %53, %56 : vector<8x256xf32>
    %58 = arith.addf %52, %57 : vector<8x256xf32>
    %c1_30 = arith.constant 1 : index
    %c0_31 = arith.constant 0 : index
    %c0_32 = arith.constant 0 : index
    %59 = vector.load %arg2[%c1_30, %c0_31, %c0_32] : memref<9x8x256xf32, #tpu.memory_space<vmem>>, vector<1x8x256xf32>
    %60 = vector.shape_cast %59 : vector<1x8x256xf32> to vector<8x256xf32>
    %61 = arith.mulf %54, %60 : vector<8x256xf32>
    %62 = arith.addf %58, %61 : vector<8x256xf32>
    %c4_33 = arith.constant 4 : index
    %c0_34 = arith.constant 0 : index
    %c0_35 = arith.constant 0 : index
    %63 = vector.load %arg2[%c4_33, %c0_34, %c0_35] : memref<9x8x256xf32, #tpu.memory_space<vmem>>, vector<1x8x256xf32>
    %64 = vector.shape_cast %63 : vector<1x8x256xf32> to vector<8x256xf32>
    %65 = arith.addf %53, %64 : vector<8x256xf32>
    %c5_36 = arith.constant 5 : index
    %c0_37 = arith.constant 0 : index
    %c0_38 = arith.constant 0 : index
    %66 = vector.load %arg2[%c5_36, %c0_37, %c0_38] : memref<9x8x256xf32, #tpu.memory_space<vmem>>, vector<1x8x256xf32>
    %67 = vector.shape_cast %66 : vector<1x8x256xf32> to vector<8x256xf32>
    %68 = arith.addf %54, %67 : vector<8x256xf32>
    %69 = arith.maximumf %65, %68 : vector<8x256xf32>
    %70 = arith.maximumf %52, %69 : vector<8x256xf32>
    %c16_i32_39 = arith.constant 16 : i32
    %71 = tpu.dynamic_rotate %62 by %c16_i32_39 dim 1 : vector<8x256xf32>, i32 -> vector<8x256xf32>
    %c240_i32_40 = arith.constant 240 : i32
    %72 = tpu.dynamic_rotate %62 by %c240_i32_40 dim 1 : vector<8x256xf32>, i32 -> vector<8x256xf32>
    %c2_41 = arith.constant 2 : index
    %c0_42 = arith.constant 0 : index
    %c0_43 = arith.constant 0 : index
    %73 = vector.load %arg2[%c2_41, %c0_42, %c0_43] : memref<9x8x256xf32, #tpu.memory_space<vmem>>, vector<1x8x256xf32>
    %74 = vector.shape_cast %73 : vector<1x8x256xf32> to vector<8x256xf32>
    %75 = arith.mulf %71, %74 : vector<8x256xf32>
    %76 = arith.addf %62, %75 : vector<8x256xf32>
    %c3_44 = arith.constant 3 : index
    %c0_45 = arith.constant 0 : index
    %c0_46 = arith.constant 0 : index
    %77 = vector.load %arg2[%c3_44, %c0_45, %c0_46] : memref<9x8x256xf32, #tpu.memory_space<vmem>>, vector<1x8x256xf32>
    %78 = vector.shape_cast %77 : vector<1x8x256xf32> to vector<8x256xf32>
    %79 = arith.mulf %72, %78 : vector<8x256xf32>
    %80 = arith.addf %76, %79 : vector<8x256xf32>
    %c8_47 = arith.constant 8 : index
    %c0_48 = arith.constant 0 : index
    %c0_49 = arith.constant 0 : index
    %81 = vector.load %arg2[%c8_47, %c0_48, %c0_49] : memref<9x8x256xf32, #tpu.memory_space<vmem>>, vector<1x8x256xf32>
    %82 = vector.shape_cast %81 : vector<1x8x256xf32> to vector<8x256xf32>
    %83 = arith.mulf %80, %82 : vector<8x256xf32>
    %c16_i32_50 = arith.constant 16 : i32
    %84 = tpu.dynamic_rotate %70 by %c16_i32_50 dim 1 : vector<8x256xf32>, i32 -> vector<8x256xf32>
    %c240_i32_51 = arith.constant 240 : i32
    %85 = tpu.dynamic_rotate %70 by %c240_i32_51 dim 1 : vector<8x256xf32>, i32 -> vector<8x256xf32>
    %c6_52 = arith.constant 6 : index
    %c0_53 = arith.constant 0 : index
    %c0_54 = arith.constant 0 : index
    %86 = vector.load %arg2[%c6_52, %c0_53, %c0_54] : memref<9x8x256xf32, #tpu.memory_space<vmem>>, vector<1x8x256xf32>
    %87 = vector.shape_cast %86 : vector<1x8x256xf32> to vector<8x256xf32>
    %88 = arith.addf %84, %87 : vector<8x256xf32>
    %c7_55 = arith.constant 7 : index
    %c0_56 = arith.constant 0 : index
    %c0_57 = arith.constant 0 : index
    %89 = vector.load %arg2[%c7_55, %c0_56, %c0_57] : memref<9x8x256xf32, #tpu.memory_space<vmem>>, vector<1x8x256xf32>
    %90 = vector.shape_cast %89 : vector<1x8x256xf32> to vector<8x256xf32>
    %91 = arith.addf %85, %90 : vector<8x256xf32>
    %92 = arith.maximumf %88, %91 : vector<8x256xf32>
    %93 = arith.maximumf %70, %92 : vector<8x256xf32>
    %c5_58 = arith.constant 5 : index
    %94 = memref.load %arg0[%c5_58] : memref<24xf32, #tpu.memory_space<smem>>
    %95 = vector.broadcast %94 : f32 to vector<8x256xf32>
    %96 = arith.mulf %95, %0 : vector<8x256xf32>
    %c6_59 = arith.constant 6 : index
    %97 = memref.load %arg0[%c6_59] : memref<24xf32, #tpu.memory_space<smem>>
    %98 = vector.broadcast %97 : f32 to vector<8x256xf32>
    %99 = arith.mulf %98, %31 : vector<8x256xf32>
    %100 = arith.addf %96, %99 : vector<8x256xf32>
    %c7_60 = arith.constant 7 : index
    %101 = memref.load %arg0[%c7_60] : memref<24xf32, #tpu.memory_space<smem>>
    %102 = vector.broadcast %101 : f32 to vector<8x256xf32>
    %103 = arith.mulf %102, %41 : vector<8x256xf32>
    %104 = arith.addf %100, %103 : vector<8x256xf32>
    %c9 = arith.constant 9 : index
    %105 = memref.load %arg0[%c9] : memref<24xf32, #tpu.memory_space<smem>>
    %106 = vector.broadcast %105 : f32 to vector<8x256xf32>
    %107 = arith.mulf %106, %52 : vector<8x256xf32>
    %c10 = arith.constant 10 : index
    %108 = memref.load %arg0[%c10] : memref<24xf32, #tpu.memory_space<smem>>
    %109 = vector.broadcast %108 : f32 to vector<8x256xf32>
    %110 = arith.mulf %109, %83 : vector<8x256xf32>
    %111 = arith.addf %107, %110 : vector<8x256xf32>
    %c11 = arith.constant 11 : index
    %112 = memref.load %arg0[%c11] : memref<24xf32, #tpu.memory_space<smem>>
    %113 = vector.broadcast %112 : f32 to vector<8x256xf32>
    %114 = arith.mulf %113, %93 : vector<8x256xf32>
    %115 = arith.addf %111, %114 : vector<8x256xf32>
    %116 = arith.addf %104, %115 : vector<8x256xf32>
    %c1_i32_61 = arith.constant 1 : i32
    %117 = tpu.dynamic_rotate %116 by %c1_i32_61 dim 1 : vector<8x256xf32>, i32 -> vector<8x256xf32>
    %c255_i32_62 = arith.constant 255 : i32
    %118 = tpu.dynamic_rotate %116 by %c255_i32_62 dim 1 : vector<8x256xf32>, i32 -> vector<8x256xf32>
    %c0_63 = arith.constant 0 : index
    %c0_64 = arith.constant 0 : index
    %c0_65 = arith.constant 0 : index
    %119 = vector.load %arg2[%c0_63, %c0_64, %c0_65] : memref<9x8x256xf32, #tpu.memory_space<vmem>>, vector<1x8x256xf32>
    %120 = vector.shape_cast %119 : vector<1x8x256xf32> to vector<8x256xf32>
    %121 = arith.mulf %117, %120 : vector<8x256xf32>
    %122 = arith.addf %116, %121 : vector<8x256xf32>
    %c1_66 = arith.constant 1 : index
    %c0_67 = arith.constant 0 : index
    %c0_68 = arith.constant 0 : index
    %123 = vector.load %arg2[%c1_66, %c0_67, %c0_68] : memref<9x8x256xf32, #tpu.memory_space<vmem>>, vector<1x8x256xf32>
    %124 = vector.shape_cast %123 : vector<1x8x256xf32> to vector<8x256xf32>
    %125 = arith.mulf %118, %124 : vector<8x256xf32>
    %126 = arith.addf %122, %125 : vector<8x256xf32>
    %c4_69 = arith.constant 4 : index
    %c0_70 = arith.constant 0 : index
    %c0_71 = arith.constant 0 : index
    %127 = vector.load %arg2[%c4_69, %c0_70, %c0_71] : memref<9x8x256xf32, #tpu.memory_space<vmem>>, vector<1x8x256xf32>
    %128 = vector.shape_cast %127 : vector<1x8x256xf32> to vector<8x256xf32>
    %129 = arith.addf %117, %128 : vector<8x256xf32>
    %c5_72 = arith.constant 5 : index
    %c0_73 = arith.constant 0 : index
    %c0_74 = arith.constant 0 : index
    %130 = vector.load %arg2[%c5_72, %c0_73, %c0_74] : memref<9x8x256xf32, #tpu.memory_space<vmem>>, vector<1x8x256xf32>
    %131 = vector.shape_cast %130 : vector<1x8x256xf32> to vector<8x256xf32>
    %132 = arith.addf %118, %131 : vector<8x256xf32>
    %133 = arith.maximumf %129, %132 : vector<8x256xf32>
    %134 = arith.maximumf %116, %133 : vector<8x256xf32>
    %c16_i32_75 = arith.constant 16 : i32
    %135 = tpu.dynamic_rotate %126 by %c16_i32_75 dim 1 : vector<8x256xf32>, i32 -> vector<8x256xf32>
    %c240_i32_76 = arith.constant 240 : i32
    %136 = tpu.dynamic_rotate %126 by %c240_i32_76 dim 1 : vector<8x256xf32>, i32 -> vector<8x256xf32>
    %c2_77 = arith.constant 2 : index
    %c0_78 = arith.constant 0 : index
    %c0_79 = arith.constant 0 : index
    %137 = vector.load %arg2[%c2_77, %c0_78, %c0_79] : memref<9x8x256xf32, #tpu.memory_space<vmem>>, vector<1x8x256xf32>
    %138 = vector.shape_cast %137 : vector<1x8x256xf32> to vector<8x256xf32>
    %139 = arith.mulf %135, %138 : vector<8x256xf32>
    %140 = arith.addf %126, %139 : vector<8x256xf32>
    %c3_80 = arith.constant 3 : index
    %c0_81 = arith.constant 0 : index
    %c0_82 = arith.constant 0 : index
    %141 = vector.load %arg2[%c3_80, %c0_81, %c0_82] : memref<9x8x256xf32, #tpu.memory_space<vmem>>, vector<1x8x256xf32>
    %142 = vector.shape_cast %141 : vector<1x8x256xf32> to vector<8x256xf32>
    %143 = arith.mulf %136, %142 : vector<8x256xf32>
    %144 = arith.addf %140, %143 : vector<8x256xf32>
    %c8_83 = arith.constant 8 : index
    %c0_84 = arith.constant 0 : index
    %c0_85 = arith.constant 0 : index
    %145 = vector.load %arg2[%c8_83, %c0_84, %c0_85] : memref<9x8x256xf32, #tpu.memory_space<vmem>>, vector<1x8x256xf32>
    %146 = vector.shape_cast %145 : vector<1x8x256xf32> to vector<8x256xf32>
    %147 = arith.mulf %144, %146 : vector<8x256xf32>
    %c16_i32_86 = arith.constant 16 : i32
    %148 = tpu.dynamic_rotate %134 by %c16_i32_86 dim 1 : vector<8x256xf32>, i32 -> vector<8x256xf32>
    %c240_i32_87 = arith.constant 240 : i32
    %149 = tpu.dynamic_rotate %134 by %c240_i32_87 dim 1 : vector<8x256xf32>, i32 -> vector<8x256xf32>
    %c6_88 = arith.constant 6 : index
    %c0_89 = arith.constant 0 : index
    %c0_90 = arith.constant 0 : index
    %150 = vector.load %arg2[%c6_88, %c0_89, %c0_90] : memref<9x8x256xf32, #tpu.memory_space<vmem>>, vector<1x8x256xf32>
    %151 = vector.shape_cast %150 : vector<1x8x256xf32> to vector<8x256xf32>
    %152 = arith.addf %148, %151 : vector<8x256xf32>
    %c7_91 = arith.constant 7 : index
    %c0_92 = arith.constant 0 : index
    %c0_93 = arith.constant 0 : index
    %153 = vector.load %arg2[%c7_91, %c0_92, %c0_93] : memref<9x8x256xf32, #tpu.memory_space<vmem>>, vector<1x8x256xf32>
    %154 = vector.shape_cast %153 : vector<1x8x256xf32> to vector<8x256xf32>
    %155 = arith.addf %149, %154 : vector<8x256xf32>
    %156 = arith.maximumf %152, %155 : vector<8x256xf32>
    %157 = arith.maximumf %134, %156 : vector<8x256xf32>
    %c13 = arith.constant 13 : index
    %158 = memref.load %arg0[%c13] : memref<24xf32, #tpu.memory_space<smem>>
    %159 = vector.broadcast %158 : f32 to vector<8x256xf32>
    %160 = arith.mulf %159, %0 : vector<8x256xf32>
    %c14 = arith.constant 14 : index
    %161 = memref.load %arg0[%c14] : memref<24xf32, #tpu.memory_space<smem>>
    %162 = vector.broadcast %161 : f32 to vector<8x256xf32>
    %163 = arith.mulf %162, %31 : vector<8x256xf32>
    %164 = arith.addf %160, %163 : vector<8x256xf32>
    %c15 = arith.constant 15 : index
    %165 = memref.load %arg0[%c15] : memref<24xf32, #tpu.memory_space<smem>>
    %166 = vector.broadcast %165 : f32 to vector<8x256xf32>
    %167 = arith.mulf %166, %41 : vector<8x256xf32>
    %168 = arith.addf %164, %167 : vector<8x256xf32>
    %c17 = arith.constant 17 : index
    %169 = memref.load %arg0[%c17] : memref<24xf32, #tpu.memory_space<smem>>
    %170 = vector.broadcast %169 : f32 to vector<8x256xf32>
    %171 = arith.mulf %170, %52 : vector<8x256xf32>
    %c18 = arith.constant 18 : index
    %172 = memref.load %arg0[%c18] : memref<24xf32, #tpu.memory_space<smem>>
    %173 = vector.broadcast %172 : f32 to vector<8x256xf32>
    %174 = arith.mulf %173, %83 : vector<8x256xf32>
    %175 = arith.addf %171, %174 : vector<8x256xf32>
    %c19 = arith.constant 19 : index
    %176 = memref.load %arg0[%c19] : memref<24xf32, #tpu.memory_space<smem>>
    %177 = vector.broadcast %176 : f32 to vector<8x256xf32>
    %178 = arith.mulf %177, %93 : vector<8x256xf32>
    %179 = arith.addf %175, %178 : vector<8x256xf32>
    %180 = arith.addf %168, %179 : vector<8x256xf32>
    %c21 = arith.constant 21 : index
    %181 = memref.load %arg0[%c21] : memref<24xf32, #tpu.memory_space<smem>>
    %182 = vector.broadcast %181 : f32 to vector<8x256xf32>
    %183 = arith.mulf %182, %116 : vector<8x256xf32>
    %c22 = arith.constant 22 : index
    %184 = memref.load %arg0[%c22] : memref<24xf32, #tpu.memory_space<smem>>
    %185 = vector.broadcast %184 : f32 to vector<8x256xf32>
    %186 = arith.mulf %185, %147 : vector<8x256xf32>
    %187 = arith.addf %183, %186 : vector<8x256xf32>
    %c23 = arith.constant 23 : index
    %188 = memref.load %arg0[%c23] : memref<24xf32, #tpu.memory_space<smem>>
    %189 = vector.broadcast %188 : f32 to vector<8x256xf32>
    %190 = arith.mulf %189, %157 : vector<8x256xf32>
    %191 = arith.addf %187, %190 : vector<8x256xf32>
    %192 = arith.addf %180, %191 : vector<8x256xf32>
    %cst = arith.constant dense<0.000000e+00> : vector<8xf32>
    %193 = vector.multi_reduction <add>, %0, %cst [1] : vector<8x256xf32> to vector<8xf32>
    %194 = vector.shape_cast %193 : vector<8xf32> to vector<8x1xf32>
    %cst_94 = arith.constant dense<0.000000e+00> : vector<8xf32>
    %195 = vector.multi_reduction <add>, %52, %cst_94 [1] : vector<8x256xf32> to vector<8xf32>
    %196 = vector.shape_cast %195 : vector<8xf32> to vector<8x1xf32>
    %cst_95 = arith.constant dense<0.000000e+00> : vector<8xf32>
    %197 = vector.multi_reduction <add>, %116, %cst_95 [1] : vector<8x256xf32> to vector<8xf32>
    %198 = vector.shape_cast %197 : vector<8xf32> to vector<8x1xf32>
    %cst_96 = arith.constant dense<0.000000e+00> : vector<8xf32>
    %199 = vector.multi_reduction <add>, %192, %cst_96 [1] : vector<8x256xf32> to vector<8xf32>
    %200 = vector.shape_cast %199 : vector<8xf32> to vector<8x1xf32>
    %cst_97 = arith.constant 0.000000e+00 : f32
    %201 = vector.broadcast %cst_97 : f32 to vector<4x128xf32>
    %202 = vector.extract_strided_slice %194 {offsets = [0, 0], sizes = [4, 1], strides = [1, 1]} : vector<8x1xf32> to vector<4x1xf32>
    %c0_98 = arith.constant 0 : index
    %c0_99 = arith.constant 0 : index
    %c0_100 = arith.constant 0 : index
    %203 = vector.load %arg3[%c0_98, %c0_99, %c0_100] : memref<4x4x128xf32, #tpu.memory_space<vmem>>, vector<1x4x128xf32>
    %204 = vector.shape_cast %203 : vector<1x4x128xf32> to vector<4x128xf32>
    %205 = vector.broadcast %202 : vector<4x1xf32> to vector<4x128xf32>
    %206 = arith.mulf %205, %204 : vector<4x128xf32>
    %207 = arith.addf %201, %206 : vector<4x128xf32>
    %208 = vector.extract_strided_slice %196 {offsets = [0, 0], sizes = [4, 1], strides = [1, 1]} : vector<8x1xf32> to vector<4x1xf32>
    %c1_101 = arith.constant 1 : index
    %c0_102 = arith.constant 0 : index
    %c0_103 = arith.constant 0 : index
    %209 = vector.load %arg3[%c1_101, %c0_102, %c0_103] : memref<4x4x128xf32, #tpu.memory_space<vmem>>, vector<1x4x128xf32>
    %210 = vector.shape_cast %209 : vector<1x4x128xf32> to vector<4x128xf32>
    %211 = vector.broadcast %208 : vector<4x1xf32> to vector<4x128xf32>
    %212 = arith.mulf %211, %210 : vector<4x128xf32>
    %213 = arith.addf %207, %212 : vector<4x128xf32>
    %214 = vector.extract_strided_slice %198 {offsets = [0, 0], sizes = [4, 1], strides = [1, 1]} : vector<8x1xf32> to vector<4x1xf32>
    %c2_104 = arith.constant 2 : index
    %c0_105 = arith.constant 0 : index
    %c0_106 = arith.constant 0 : index
    %215 = vector.load %arg3[%c2_104, %c0_105, %c0_106] : memref<4x4x128xf32, #tpu.memory_space<vmem>>, vector<1x4x128xf32>
    %216 = vector.shape_cast %215 : vector<1x4x128xf32> to vector<4x128xf32>
    %217 = vector.broadcast %214 : vector<4x1xf32> to vector<4x128xf32>
    %218 = arith.mulf %217, %216 : vector<4x128xf32>
    %219 = arith.addf %213, %218 : vector<4x128xf32>
    %220 = vector.extract_strided_slice %200 {offsets = [0, 0], sizes = [4, 1], strides = [1, 1]} : vector<8x1xf32> to vector<4x1xf32>
    %c3_107 = arith.constant 3 : index
    %c0_108 = arith.constant 0 : index
    %c0_109 = arith.constant 0 : index
    %221 = vector.load %arg3[%c3_107, %c0_108, %c0_109] : memref<4x4x128xf32, #tpu.memory_space<vmem>>, vector<1x4x128xf32>
    %222 = vector.shape_cast %221 : vector<1x4x128xf32> to vector<4x128xf32>
    %223 = vector.broadcast %220 : vector<4x1xf32> to vector<4x128xf32>
    %224 = arith.mulf %223, %222 : vector<4x128xf32>
    %225 = arith.addf %219, %224 : vector<4x128xf32>
    %cst_110 = arith.constant dense<0.000000e+00> : vector<128xf32>
    %226 = vector.multi_reduction <add>, %225, %cst_110 [0] : vector<4x128xf32> to vector<128xf32>
    %227 = vector.shape_cast %226 : vector<128xf32> to vector<1x128xf32>
    %cst_111 = arith.constant 0.000000e+00 : f32
    %228 = vector.broadcast %cst_111 : f32 to vector<4x128xf32>
    %229 = vector.extract_strided_slice %194 {offsets = [4, 0], sizes = [4, 1], strides = [1, 1]} : vector<8x1xf32> to vector<4x1xf32>
    %c0_112 = arith.constant 0 : index
    %c0_113 = arith.constant 0 : index
    %c0_114 = arith.constant 0 : index
    %230 = vector.load %arg3[%c0_112, %c0_113, %c0_114] : memref<4x4x128xf32, #tpu.memory_space<vmem>>, vector<1x4x128xf32>
    %231 = vector.shape_cast %230 : vector<1x4x128xf32> to vector<4x128xf32>
    %232 = vector.broadcast %229 : vector<4x1xf32> to vector<4x128xf32>
    %233 = arith.mulf %232, %231 : vector<4x128xf32>
    %234 = arith.addf %228, %233 : vector<4x128xf32>
    %235 = vector.extract_strided_slice %196 {offsets = [4, 0], sizes = [4, 1], strides = [1, 1]} : vector<8x1xf32> to vector<4x1xf32>
    %c1_115 = arith.constant 1 : index
    %c0_116 = arith.constant 0 : index
    %c0_117 = arith.constant 0 : index
    %236 = vector.load %arg3[%c1_115, %c0_116, %c0_117] : memref<4x4x128xf32, #tpu.memory_space<vmem>>, vector<1x4x128xf32>
    %237 = vector.shape_cast %236 : vector<1x4x128xf32> to vector<4x128xf32>
    %238 = vector.broadcast %235 : vector<4x1xf32> to vector<4x128xf32>
    %239 = arith.mulf %238, %237 : vector<4x128xf32>
    %240 = arith.addf %234, %239 : vector<4x128xf32>
    %241 = vector.extract_strided_slice %198 {offsets = [4, 0], sizes = [4, 1], strides = [1, 1]} : vector<8x1xf32> to vector<4x1xf32>
    %c2_118 = arith.constant 2 : index
    %c0_119 = arith.constant 0 : index
    %c0_120 = arith.constant 0 : index
    %242 = vector.load %arg3[%c2_118, %c0_119, %c0_120] : memref<4x4x128xf32, #tpu.memory_space<vmem>>, vector<1x4x128xf32>
    %243 = vector.shape_cast %242 : vector<1x4x128xf32> to vector<4x128xf32>
    %244 = vector.broadcast %241 : vector<4x1xf32> to vector<4x128xf32>
    %245 = arith.mulf %244, %243 : vector<4x128xf32>
    %246 = arith.addf %240, %245 : vector<4x128xf32>
    %247 = vector.extract_strided_slice %200 {offsets = [4, 0], sizes = [4, 1], strides = [1, 1]} : vector<8x1xf32> to vector<4x1xf32>
    %c3_121 = arith.constant 3 : index
    %c0_122 = arith.constant 0 : index
    %c0_123 = arith.constant 0 : index
    %248 = vector.load %arg3[%c3_121, %c0_122, %c0_123] : memref<4x4x128xf32, #tpu.memory_space<vmem>>, vector<1x4x128xf32>
    %249 = vector.shape_cast %248 : vector<1x4x128xf32> to vector<4x128xf32>
    %250 = vector.broadcast %247 : vector<4x1xf32> to vector<4x128xf32>
    %251 = arith.mulf %250, %249 : vector<4x128xf32>
    %252 = arith.addf %246, %251 : vector<4x128xf32>
    %cst_124 = arith.constant dense<0.000000e+00> : vector<128xf32>
    %253 = vector.multi_reduction <add>, %252, %cst_124 [0] : vector<4x128xf32> to vector<128xf32>
    %254 = vector.shape_cast %253 : vector<128xf32> to vector<1x128xf32>
    %c0_125 = arith.constant 0 : index
    %c0_126 = arith.constant 0 : index
    %255 = vector.load %arg4[%c0_125, %c0_126] : memref<1x128xf32, #tpu.memory_space<vmem>>, vector<1x128xf32>
    %256 = tpu.concatenate %227, %254 in 0 : vector<1x128xf32>, vector<1x128xf32> -> vector<2x128xf32>
    %257 = vector.broadcast %255 : vector<1x128xf32> to vector<2x128xf32>
    %258 = arith.addf %257, %256 : vector<2x128xf32>
    %c0_127 = arith.constant 0 : index
    %c0_128 = arith.constant 0 : index
    %259 = vector.load %arg5[%c0_127, %c0_128] : memref<2x128xf32, #tpu.memory_space<vmem>>, vector<2x128xf32>
    tpu.vector_store %arg5[%c0_127, %c0_128], %258 {strides = array<i32>} : memref<2x128xf32, #tpu.memory_space<vmem>>, vector<2x128xf32>,
    return
  }
}

</mosaic_0001>

<bundles_post_ra>
// kernel: supernet_forward.1
= control target key start
LH: loop header
LB: loop body
LE: loop exit
PB: predicated region body
PF: predicated region fallthrough
CT: control target
= control target key end

     0   :  { %10 = vsyncpa [#allocation4], 0  ;;  %s999_s0 = inlined_call_operand.vmem [shape: f32[24], index: 0, kind: input, shape index: {}]   ;;  %s1000_s1 = inlined_call_operand.vmem [shape: f32[8,256], index: 1, kind: input, shape index: {}]   ;;  %s1001_s2 = inlined_call_operand.vmem [shape: f32[9,8,256], index: 2, kind: input, shape index: {}]   ;;  %s1002_s3 = inlined_call_operand.vmem [shape: f32[4,4,128], index: 3, kind: input, shape index: {}]   ;;  %s1003_s4 = inlined_call_operand.vmem [shape: f32[1,128], index: 4, kind: input, shape index: {}]   ;;  %s1004_s5 = inlined_call_operand.hbm [shape: f32[2,128], index: 5, kind: output, shape index: {}]  }
   0x1   :  { %11 = vsyncpa [#allocation3], 0  ;;  %s18_s20 = sshll.u32 %s999_s0, 4  ;;  %s19_s20 = int_to_ptr.vmem [resolvable:$true] %s18_s20 }
   0x2   :  { %s515_s21 = scalar_lea.vmem %s19_s20, 16  ;;  %p520_p1 = scmp.lt.s32.totalorder %s19_s20, %s19_s20 }
   0x3   :  { %p516_p0 = scmp.ne.s32.totalorder %s19_s20, %s515_s21  ;;  %p521_p2 = scmp.lt.s32.totalorder %s515_s21, %s515_s21 }
   0x5   :  { %p522_p3 = por %p521_p2, %p520_p1 }
   0x7   :  { %p523_p4 = pnand %p522_p3, %p516_p0 }
   0x9   :  { %526 = shalt.err (!%p523_p4)
}
   0xa   :  { %s551_s22 = smov [#allocation2]  }
   0xb   :  { %21 = dma.vmem_to_smem %s19_s20, 16, %s551_s22, [#allocation4]  }
   0xc   :  { %547 = dma.done.wait [#allocation4], 16  }
   0xd   :  { %548 = vsyncadd [#allocation4], 4294967280 }
   0xe   :  { %33 = sfence }
   0xf   :  { %v593_v0 = vld [vmem:[%s1000_s1] sm:$0xff]  ;;  %s552_s25 = smov 127   ;;  %s553_s0 = smov 1   ;;  %v602_v1 = vld [vmem:[%s1000_s1 + $0x8] sm:$0xff]  ;;  %v40_v2 = vlaneseq  ;;  %v629_v12 = vld [vmem:[%s1001_s2 + $0x10] sm:$0xff]  ;;  %vm407_vm4 = vcmask 1043456  }
  0x10   :  { %45 = vrot.lane.b32.xlu1 %v593_v0, %s552_s25  ;;  %36 = vrot.lane.b32.xlu0 %v593_v0, %s553_s0  ;;  %v615_v7 = vld [vmem:[%s1001_s2] sm:$0xff]  ;;  %v620_v8 = vld [vmem:[%s1001_s2 + $0x8] sm:$0xff]  ;;  %s554_s18 = smov 16   ;;  %s555_s19 = smov 112   ;;  %vm446_vm5 = vcmask 1040384  }
  0x11   :  { %v608_v3 = vand.u32 127, %v40_v2  ;;  %v634_v13 = vld [vmem:[%s1001_s2 + $0x18] sm:$0xff]  ;;  %v643_v16 = vld [vmem:[%s1001_s2 + $0x50] sm:$0xff]  ;;  %v655_v20 = vld [vmem:[%s1001_s2 + $0x40] sm:$0xff]  ;;  %s699_s24 = sld [smem:[#allocation2 + $0x1]] }
  0x12   :  { %v648_v17 = vld [vmem:[%s1001_s2 + $0x58] sm:$0xff]  ;;  %v660_v21 = vld [vmem:[%s1001_s2 + $0x48] sm:$0xff]  ;;  %v692_v36 = vld [vmem:[%s1001_s2 + $0x20] sm:$0xff]  ;;  %s708_s26 = sld [smem:[#allocation2 + $0x2]] }
  0x13   :  { %vm42_vm0 = vcmp.lt.s32.totalorder %v608_v3, 1  ;;  %vm49_vm1 = vcmp.lt.s32.totalorder %v608_v3, 127  ;;  %vm83_vm2 = vcmp.lt.s32.totalorder %v608_v3, 16  ;;  %v697_v37 = vld [vmem:[%s1001_s2 + $0x28] sm:$0xff]  ;;  %vm90_vm3 = vcmp.lt.s32.totalorder %v608_v3, 112  ;;  %v713_v44 = vld [vmem:[%s1001_s2 + $0x30] sm:$0xff] }
  0x14   :  { %47 = vrot.lane.b32.xlu1 %v602_v1, %s552_s25  ;;  %38 = vrot.lane.b32.xlu0 %v602_v1, %s553_s0  ;;  %v718_v45 = vld [vmem:[%s1001_s2 + $0x38] sm:$0xff]  ;;  %s720_s30 = sld [smem:[#allocation2 + $0x5]]  ;;  %v738_v59 = vld [vmem:[%s1001_s2 + $0x80] sm:$0xff] }
  0x15   :  { %s722_s6 = sld [smem:[#allocation2 + $0x6]]  ;;  %v743_v60 = vld [vmem:[%s1001_s2 + $0x88] sm:$0xff]  ;;  %v755_v2 = vld [vmem:[%s1001_s2 + $0x60] sm:$0xff] }
  0x16   :  { %s724_s7 = sld [smem:[#allocation2 + $0xe]] }
  0x17   :  { %s732_s8 = sld [smem:[#allocation2 + $0xd]]  ;;  %v139_v54 = vstv %s699_s24 }
  0x18   :  { %s745_s13 = sld [smem:[#allocation2 + $0x3]]  ;;  %v141_v61 = vmul.f32 %v139_v54, %v602_v1  ;;  %v143_v62 = vstv %s708_s26 }
  0x19   :  { %s747_s14 = sld [smem:[#allocation2 + $0x7]] }
  0x1a   :  { %v225_v63 = vstv %s720_s30  ;;  %s757_s17 = sld [smem:[#allocation2 + $0xf]] }
  0x1b   :  { %s857_s27 = sld [smem:[#allocation2 + $0xa]] }
  0x1c   :  { %s859_s28 = sld [smem:[#allocation2 + $0x12]] }
  0x1d   :  { %s865_s29 = sld [smem:[#allocation2 + $0x11]] }
  0x1e   :  { %s869_s1 = sld [smem:[#allocation2 + $0xb]] }
  0x1f   :  { %s871_s30 = sld [smem:[#allocation2 + $0x13]] }
  0x82   :  { %v46_v4 = vpop.permute.xlu1 %45  ;;  %v37_v5 = vpop.permute.xlu0 %36 }
  0x86   :  { %v48_v6 = vpop.permute.xlu1 %47  ;;  %v39_v9 = vpop.permute.xlu0 %38 }
  0x87   :  { %v43_v10 = vsel %vm42_vm0, %v37_v5, %v39_v9  ;;  %v44_v11 = vsel %vm42_vm0, %v39_v9, %v37_v5  ;;  %v50_v14 = vsel %vm49_vm1, %v46_v4, %v48_v6  ;;  %v51_v15 = vsel %vm49_vm1, %v48_v6, %v46_v4  ;;  %v764_v6 = vld [vmem:[%s1001_s2 + $0x68] sm:$0xff] }
  0x88   :  { %v54_v18 = vmul.f32 %v615_v7, %v44_v11  ;;  %v55_v19 = vmul.f32 %v620_v8, %v43_v10  ;;  %v61_v22 = vmul.f32 %v629_v12, %v50_v14  ;;  %v62_v23 = vmul.f32 %v634_v13, %v51_v15 }
  0x89   :  { %v73_v26 = vadd.f32 %v643_v16, %v50_v14  ;;  %v74_v27 = vadd.f32 %v648_v17, %v51_v15  ;;  %v68_v28 = vadd.f32 %v655_v20, %v44_v11  ;;  %v69_v29 = vadd.f32 %v660_v21, %v43_v10  ;;  %v773_v14 = vld [vmem:[%s1001_s2 + $0x70] sm:$0xff]  ;;  %v778_v15 = vld [vmem:[%s1001_s2 + $0x78] sm:$0xff]  ;;  %s855_s2 = sld [smem:[#allocation2 + $0x9]] }
  0x8a   :  { %v56_v24 = vadd.f32 %v54_v18, %v593_v0  ;;  %v57_v25 = vadd.f32 %v55_v19, %v602_v1  ;;  %v229_v19 = vstv %s722_s6 }
  0x8b   :  { %v75_v32 = vmax.f32 %v68_v28, %v73_v26  ;;  %v76_v33 = vmax.f32 %v69_v29, %v74_v27  ;;  %v333_v26 = vstv %s724_s7  ;;  %v226_v27 = vmul.f32 %v225_v63, %v593_v0 }
  0x8c   :  { %v63_v30 = vadd.f32 %v61_v22, %v56_v24  ;;  %v64_v31 = vadd.f32 %v62_v23, %v57_v25  ;;  %v140_v22 = vmul.f32 %v139_v54, %v593_v0  ;;  %v227_v25 = vmul.f32 %v225_v63, %v602_v1 }
  0x8d   :  { %v675_v34 = vmax.f32 %v593_v0, %v75_v32  ;;  %v678_v35 = vmax.f32 %v602_v1, %v76_v33  ;;  %v329_v28 = vstv %s732_s8 }
  0x8e   :  { %79 = vrot.lane.b32.xlu0 %v63_v30, %s554_s18  ;;  %81 = vrot.lane.b32.xlu1 %v64_v31, %s554_s18 }
  0x92   :  { %86 = vrot.lane.b32.xlu0 %v63_v30, %s555_s19  ;;  %88 = vrot.lane.b32.xlu1 %v64_v31, %s555_s19 }
  0x96   :  { %112 = vrot.lane.b32.xlu0 %v675_v34, %s554_s18  ;;  %114 = vrot.lane.b32.xlu1 %v678_v35, %s554_s18 }
  0x9a   :  { %118 = vrot.lane.b32.xlu0 %v675_v34, %s555_s19  ;;  %120 = vrot.lane.b32.xlu1 %v678_v35, %s555_s19 }
 0x100   :  { %v80_v38 = vpop.permute.xlu0 %79  ;;  %v82_v39 = vpop.permute.xlu1 %81 }
 0x101   :  { %v84_v40 = vsel %vm83_vm2, %v80_v38, %v82_v39  ;;  %v85_v41 = vsel %vm83_vm2, %v82_v39, %v80_v38 }
 0x102   :  { %v96_v42 = vmul.f32 %v692_v36, %v85_v41  ;;  %v97_v43 = vmul.f32 %v697_v37, %v84_v40 }
 0x104   :  { %v87_v46 = vpop.permute.xlu0 %86  ;;  %v89_v47 = vpop.permute.xlu1 %88  ;;  %v98_v50 = vadd.f32 %v96_v42, %v63_v30  ;;  %v99_v51 = vadd.f32 %v97_v43, %v64_v31  ;;  %v330_v43 = vmul.f32 %v329_v28, %v593_v0 }
 0x105   :  { %v91_v48 = vsel %vm90_vm3, %v87_v46, %v89_v47  ;;  %v92_v49 = vsel %vm90_vm3, %v89_v47, %v87_v46  ;;  %v331_v46 = vmul.f32 %v329_v28, %v602_v1 }
 0x106   :  { %v103_v52 = vmul.f32 %v713_v44, %v91_v48  ;;  %v104_v53 = vmul.f32 %v718_v45, %v92_v49  ;;  %v149_v49 = vstv %s745_s13 }
 0x108   :  { %v105_v55 = vadd.f32 %v103_v52, %v98_v50  ;;  %v106_v56 = vadd.f32 %v104_v53, %v99_v51  ;;  %v113_v57 = vpop.permute.xlu0 %112  ;;  %v115_v58 = vpop.permute.xlu1 %114  ;;  %v235_v50 = vstv %s747_s14  ;;  %v339_v53 = vstv %s757_s17  ;;  %s556_s14 = smov [#allocation5]  }
 0x109   :  { %v116_v9 = vsel %vm83_vm2, %v113_v57, %v115_v58  ;;  %v117_v10 = vsel %vm83_vm2, %v115_v58, %v113_v57  ;;  %s462_s15 = sshll.u32 %s556_s14, 4  ;;  %s463_s15 = int_to_ptr.vmem [resolvable:$true] %s462_s15 }
 0x10a   :  { %v110_v4 = vmul.f32 %v738_v59, %v105_v55  ;;  %v111_v5 = vmul.f32 %v743_v60, %v106_v56  ;;  %v127_v29 = vadd.f32 %v755_v2, %v117_v10  ;;  %v128_v30 = vadd.f32 %v764_v6, %v116_v9  ;;  %s527_s16 = scalar_lea.vmem %s463_s15, 32  ;;  %p532_p6 = scmp.lt.s32.totalorder %s463_s15, %s463_s15 }
 0x10b   :  { %p528_p5 = scmp.ne.s32.totalorder %s463_s15, %s527_s16  ;;  %p533_p7 = scmp.lt.s32.totalorder %s527_s16, %s527_s16 }
 0x10c   :  { %v119_v11 = vpop.permute.xlu0 %118  ;;  %v121_v18 = vpop.permute.xlu1 %120  ;;  %v144_v33 = vmul.f32 %v143_v62, %v110_v4  ;;  %v145_v38 = vmul.f32 %v143_v62, %v111_v5  ;;  %v230_v39 = vmul.f32 %v229_v19, %v110_v4  ;;  %v231_v40 = vmul.f32 %v229_v19, %v111_v5 }
 0x10d   :  { %v122_v23 = vsel %vm90_vm3, %v119_v11, %v121_v18  ;;  %v123_v24 = vsel %vm90_vm3, %v121_v18, %v119_v11  ;;  %v334_v47 = vmul.f32 %v333_v26, %v110_v4  ;;  %v335_v48 = vmul.f32 %v333_v26, %v111_v5  ;;  %p534_p8 = por %p533_p7, %p532_p6 }
 0x10e   :  { %v132_v31 = vadd.f32 %v773_v14, %v122_v23  ;;  %v133_v32 = vadd.f32 %v778_v15, %v123_v24  ;;  %v146_v54 = vadd.f32 %v144_v33, %v140_v22  ;;  %v147_v55 = vadd.f32 %v145_v38, %v141_v61 }
 0x10f   :  { %v232_v56 = vadd.f32 %v230_v39, %v226_v27  ;;  %v233_v57 = vadd.f32 %v231_v40, %v227_v25  ;;  %v336_v10 = vadd.f32 %v334_v47, %v330_v43  ;;  %v337_v11 = vadd.f32 %v335_v48, %v331_v46  ;;  %p535_p9 = pnand %p534_p8, %p528_p5 }
 0x110   :  { %v134_v41 = vmax.f32 %v127_v29, %v132_v31  ;;  %v135_v42 = vmax.f32 %v128_v30, %v133_v32 }
 0x112   :  { %v136_v51 = vmax.f32 %v675_v34, %v134_v41  ;;  %v137_v52 = vmax.f32 %v678_v35, %v135_v42 }
 0x114   :  { %v150_v58 = vmul.f32 %v149_v49, %v136_v51  ;;  %v151_v62 = vmul.f32 %v149_v49, %v137_v52  ;;  %v236_v63 = vmul.f32 %v235_v50, %v136_v51  ;;  %v237_v9 = vmul.f32 %v235_v50, %v137_v52 }
 0x115   :  { %v340_v18 = vmul.f32 %v339_v53, %v136_v51  ;;  %v341_v4 = vmul.f32 %v339_v53, %v137_v52 }
 0x116   :  { %v801_v5 = vadd.f32 %v150_v58, %v146_v54  ;;  %v803_v19 = vadd.f32 %v151_v62, %v147_v55  ;;  %v805_v34 = vadd.f32 %v236_v63, %v232_v56  ;;  %v807_v35 = vadd.f32 %v237_v9, %v233_v57 }
 0x117   :  { %v809_v22 = vadd.f32 %v340_v18, %v336_v10  ;;  %v811_v61 = vadd.f32 %v341_v4, %v337_v11 }
 0x118   :  { %156 = vrot.lane.b32.xlu1 %v803_v19, %s553_s0  ;;  %154 = vrot.lane.b32.xlu0 %v801_v5, %s553_s0 }
 0x11c   :  { %162 = vrot.lane.b32.xlu1 %v803_v19, %s552_s25  ;;  %160 = vrot.lane.b32.xlu0 %v801_v5, %s552_s25 }
 0x18a   :  { %v157_v23 = vpop.permute.xlu1 %156  ;;  %v155_v24 = vpop.permute.xlu0 %154 }
 0x18b   :  { %v158_v25 = vsel %vm42_vm0, %v155_v24, %v157_v23  ;;  %v159_v26 = vsel %vm42_vm0, %v157_v23, %v155_v24 }
 0x18c   :  { %v166_v27 = vmul.f32 %v159_v26, %v615_v7  ;;  %v167_v28 = vmul.f32 %v158_v25, %v620_v8  ;;  %v174_v47 = vadd.f32 %v655_v20, %v159_v26  ;;  %v175_v48 = vadd.f32 %v660_v21, %v158_v25 }
 0x18e   :  { %v163_v29 = vpop.permute.xlu1 %162  ;;  %v161_v30 = vpop.permute.xlu0 %160  ;;  %v168_v33 = vadd.f32 %v166_v27, %v801_v5  ;;  %v169_v38 = vadd.f32 %v167_v28, %v803_v19 }
 0x18f   :  { %v164_v31 = vsel %vm49_vm1, %v161_v30, %v163_v29  ;;  %v165_v32 = vsel %vm49_vm1, %v163_v29, %v161_v30 }
 0x190   :  { %v170_v39 = vmul.f32 %v629_v12, %v164_v31  ;;  %v171_v40 = vmul.f32 %v634_v13, %v165_v32  ;;  %v176_v41 = vadd.f32 %v643_v16, %v164_v31  ;;  %v177_v42 = vadd.f32 %v648_v17, %v165_v32 }
 0x191   :  { %v245_v32 = vstv %s857_s27 }
 0x192   :  { %v173_v43 = vadd.f32 %v171_v40, %v169_v38  ;;  %v172_v46 = vadd.f32 %v170_v39, %v168_v33  ;;  %v178_v49 = vmax.f32 %v174_v47, %v176_v41  ;;  %v179_v50 = vmax.f32 %v175_v48, %v177_v42 }
 0x193   :  { %v349_v33 = vstv %s859_s28  ;;  %v241_v40 = vstv %s855_s2 }
 0x194   :  { %184 = vrot.lane.b32.xlu1 %v173_v43, %s554_s18  ;;  %182 = vrot.lane.b32.xlu0 %v172_v46, %s554_s18  ;;  %v181_v51 = vmax.f32 %v803_v19, %v179_v50  ;;  %v180_v52 = vmax.f32 %v801_v5, %v178_v49 }
 0x198   :  { %190 = vrot.lane.b32.xlu1 %v173_v43, %s555_s19  ;;  %188 = vrot.lane.b32.xlu0 %v172_v46, %s555_s19 }
 0x19c   :  { %206 = vrot.lane.b32.xlu1 %v181_v51, %s554_s18  ;;  %204 = vrot.lane.b32.xlu0 %v180_v52, %s554_s18 }
 0x1a0   :  { %212 = vrot.lane.b32.xlu1 %v181_v51, %s555_s19  ;;  %210 = vrot.lane.b32.xlu0 %v180_v52, %s555_s19 }
 0x206   :  { %v185_v53 = vpop.permute.xlu1 %184  ;;  %v183_v54 = vpop.permute.xlu0 %182 }
 0x207   :  { %v186_v55 = vsel %vm83_vm2, %v183_v54, %v185_v53  ;;  %v187_v56 = vsel %vm83_vm2, %v185_v53, %v183_v54 }
 0x208   :  { %v194_v57 = vmul.f32 %v692_v36, %v187_v56  ;;  %v195_v58 = vmul.f32 %v697_v37, %v186_v55  ;;  %v243_v56 = vmul.f32 %v241_v40, %v803_v19 }
 0x20a   :  { %v191_v62 = vpop.permute.xlu1 %190  ;;  %v189_v63 = vpop.permute.xlu0 %188  ;;  %v196_v11 = vadd.f32 %v194_v57, %v172_v46  ;;  %v197_v18 = vadd.f32 %v195_v58, %v173_v43  ;;  %v345_v43 = vstv %s865_s29  ;;  %v242_v57 = vmul.f32 %v241_v40, %v801_v5 }
 0x20b   :  { %v192_v9 = vsel %vm90_vm3, %v189_v63, %v191_v62  ;;  %v193_v10 = vsel %vm90_vm3, %v191_v62, %v189_v63  ;;  %v251_v63 = vstv %s869_s1 }
 0x20c   :  { %v198_v4 = vmul.f32 %v713_v44, %v192_v9  ;;  %v199_v23 = vmul.f32 %v718_v45, %v193_v10  ;;  %v355_v9 = vstv %s871_s30  ;;  %v346_v10 = vmul.f32 %v345_v43, %v801_v5 }
 0x20e   :  { %v200_v24 = vadd.f32 %v198_v4, %v196_v11  ;;  %v201_v25 = vadd.f32 %v199_v23, %v197_v18  ;;  %v207_v26 = vpop.permute.xlu1 %206  ;;  %v205_v27 = vpop.permute.xlu0 %204  ;;  %v347_v11 = vmul.f32 %v345_v43, %v803_v19 }
 0x20f   :  { %v208_v30 = vsel %vm83_vm2, %v205_v27, %v207_v26  ;;  %v209_v31 = vsel %vm83_vm2, %v207_v26, %v205_v27 }
 0x210   :  { %v202_v28 = vmul.f32 %v738_v59, %v200_v24  ;;  %v203_v29 = vmul.f32 %v743_v60, %v201_v25  ;;  %v216_v46 = vadd.f32 %v755_v2, %v209_v31  ;;  %v217_v47 = vadd.f32 %v764_v6, %v208_v30 }
 0x212   :  { %v213_v38 = vpop.permute.xlu1 %212  ;;  %v211_v39 = vpop.permute.xlu0 %210  ;;  %v246_v50 = vmul.f32 %v245_v32, %v202_v28  ;;  %v247_v53 = vmul.f32 %v245_v32, %v203_v29  ;;  %v350_v54 = vmul.f32 %v349_v33, %v202_v28  ;;  %v351_v55 = vmul.f32 %v349_v33, %v203_v29 }
 0x213   :  { %v214_v41 = vsel %vm90_vm3, %v211_v39, %v213_v38  ;;  %v215_v42 = vsel %vm90_vm3, %v213_v38, %v211_v39 }
 0x214   :  { %v218_v48 = vadd.f32 %v773_v14, %v214_v41  ;;  %v219_v49 = vadd.f32 %v778_v15, %v215_v42  ;;  %v248_v23 = vadd.f32 %v246_v50, %v242_v57  ;;  %v249_v24 = vadd.f32 %v247_v53, %v243_v56 }
 0x215   :  { %v352_v25 = vadd.f32 %v350_v54, %v346_v10  ;;  %v353_v26 = vadd.f32 %v351_v55, %v347_v11 }
 0x216   :  { %v220_v58 = vmax.f32 %v216_v46, %v218_v48  ;;  %v221_v62 = vmax.f32 %v217_v47, %v219_v49 }
 0x218   :  { %v222_v18 = vmax.f32 %v180_v52, %v220_v58  ;;  %v223_v4 = vmax.f32 %v181_v51, %v221_v62 }
 0x21a   :  { %v252_v27 = vmul.f32 %v251_v63, %v222_v18  ;;  %v253_v28 = vmul.f32 %v251_v63, %v223_v4  ;;  %v356_v29 = vmul.f32 %v355_v9, %v222_v18  ;;  %v357_v30 = vmul.f32 %v355_v9, %v223_v4 }
 0x21c   :  { %v254_v31 = vadd.f32 %v252_v27, %v248_v23  ;;  %v255_v32 = vadd.f32 %v253_v28, %v249_v24  ;;  %v358_v33 = vadd.f32 %v356_v29, %v352_v25  ;;  %v359_v38 = vadd.f32 %v357_v30, %v353_v26 }
 0x21e   :  { %v898_v39 = vadd.f32 %v254_v31, %v805_v34  ;;  %v901_v40 = vadd.f32 %v255_v32, %v807_v35  ;;  %v904_v51 = vadd.f32 %v358_v33, %v809_v22  ;;  %v907_v52 = vadd.f32 %v359_v38, %v811_v61 }
 0x220   :  { %260 = vrot.lane.b32.xlu1 %v901_v40, %s553_s0  ;;  %258 = vrot.lane.b32.xlu0 %v898_v39, %s553_s0  ;;  %s502_s0 = sld [smem:[#allocation2 + $0x15]] }
 0x224   :  { %266 = vrot.lane.b32.xlu1 %v901_v40, %s552_s25  ;;  %264 = vrot.lane.b32.xlu0 %v898_v39, %s552_s25  ;;  %s503_s25 = sld [smem:[#allocation2 + $0x16]] }
 0x22a   :  { %v367_v38 = vstv %s503_s25 }
 0x292   :  { %v261_v34 = vpop.permute.xlu1 %260  ;;  %v259_v35 = vpop.permute.xlu0 %258 }
 0x293   :  { %v262_v22 = vsel %vm42_vm0, %v259_v35, %v261_v34  ;;  %v263_v61 = vsel %vm42_vm0, %v261_v34, %v259_v35 }
 0x294   :  { %v270_v41 = vmul.f32 %v263_v61, %v615_v7  ;;  %v271_v42 = vmul.f32 %v262_v22, %v620_v8  ;;  %v278_v57 = vadd.f32 %v655_v20, %v263_v61  ;;  %v279_v58 = vadd.f32 %v660_v21, %v262_v22 }
 0x295   :  { %v383_v20 = vadd.f32 %v803_v19, %v801_v5 }
 0x296   :  { %v267_v43 = vpop.permute.xlu1 %266  ;;  %v265_v46 = vpop.permute.xlu0 %264  ;;  %v272_v49 = vadd.f32 %v270_v41, %v898_v39  ;;  %v273_v50 = vadd.f32 %v271_v42, %v901_v40 }
 0x297   :  { %v268_v47 = vsel %vm49_vm1, %v265_v46, %v267_v43  ;;  %v269_v48 = vsel %vm49_vm1, %v267_v43, %v265_v46 }
 0x298   :  { %v274_v53 = vmul.f32 %v629_v12, %v268_v47  ;;  %v275_v54 = vmul.f32 %v634_v13, %v269_v48  ;;  %v280_v7 = vadd.f32 %v643_v16, %v268_v47  ;;  %v281_v8 = vadd.f32 %v648_v17, %v269_v48 }
 0x299   :  { %v380_v16 = vadd.f32 %v602_v1, %v593_v0  ;;  %v386_v17 = vadd.f32 %v901_v40, %v898_v39 }
 0x29a   :  { %v277_v55 = vadd.f32 %v275_v54, %v273_v50  ;;  %v276_v56 = vadd.f32 %v274_v53, %v272_v49  ;;  %v282_v62 = vmax.f32 %v278_v57, %v280_v7  ;;  %v283_v63 = vmax.f32 %v279_v58, %v281_v8 }
 0x29c   :  { %288 = vrot.lane.b32.xlu1 %v277_v55, %s554_s18  ;;  %286 = vrot.lane.b32.xlu0 %v276_v56, %s554_s18  ;;  %v285_v12 = vmax.f32 %v901_v40, %v283_v63  ;;  %v284_v13 = vmax.f32 %v898_v39, %v282_v62 }
 0x2a0   :  { %294 = vrot.lane.b32.xlu1 %v277_v55, %s555_s19  ;;  %292 = vrot.lane.b32.xlu0 %v276_v56, %s555_s19 }
 0x2a4   :  { %310 = vrot.lane.b32.xlu1 %v285_v12, %s554_s18  ;;  %308 = vrot.lane.b32.xlu0 %v284_v13, %s554_s18  ;;  %s504_s18 = sld [smem:[#allocation2 + $0x17]] }
 0x2a8   :  { %316 = vrot.lane.b32.xlu1 %v285_v12, %s555_s19  ;;  %314 = vrot.lane.b32.xlu0 %v284_v13, %s555_s19 }
 0x2aa   :  { %v373_v47 = vstv %s504_s18 }
 0x2c7   :  { %381 = vadd.xlane.f32.xlu0 %v380_v16  ;;  %v507_v16 = vld [vmem:[%s1002_s3 + $0xc] sm:$0xf] }
 0x2cb   :  { %387 = vadd.xlane.f32.xlu0 %v386_v17 }
 0x2cc   :  { %384 = vadd.xlane.f32.xlu1 %v383_v20 }
 0x30e   :  { %v289_v21 = vpop.permute.xlu1 %288  ;;  %v287_v9 = vpop.permute.xlu0 %286 }
 0x30f   :  { %v290_v10 = vsel %vm83_vm2, %v287_v9, %v289_v21  ;;  %v291_v11 = vsel %vm83_vm2, %v289_v21, %v287_v9 }
 0x310   :  { %v298_v18 = vmul.f32 %v692_v36, %v291_v11  ;;  %v299_v0 = vmul.f32 %v697_v37, %v290_v10  ;;  %v431_v10 = vrot.slane %v507_v16, 4 }
 0x312   :  { %v295_v1 = vpop.permute.xlu1 %294  ;;  %v293_v4 = vpop.permute.xlu0 %292  ;;  %v300_v23 = vadd.f32 %v298_v18, %v276_v56  ;;  %v301_v24 = vadd.f32 %v299_v0, %v277_v55  ;;  %v392_v56 = vld [vmem:[%s1002_s3] sm:$0xf] }
 0x313   :  { %v296_v5 = vsel %vm90_vm3, %v293_v4, %v295_v1  ;;  %v297_v19 = vsel %vm90_vm3, %v295_v1, %v293_v4 }
 0x314   :  { %v302_v25 = vmul.f32 %v713_v44, %v296_v5  ;;  %v303_v26 = vmul.f32 %v718_v45, %v297_v19 }
 0x316   :  { %v304_v27 = vadd.f32 %v302_v25, %v300_v23  ;;  %v305_v36 = vadd.f32 %v303_v26, %v301_v24  ;;  %v311_v28 = vpop.permute.xlu1 %310  ;;  %v309_v37 = vpop.permute.xlu0 %308 }
 0x317   :  { %v312_v29 = vsel %vm83_vm2, %v309_v37, %v311_v28  ;;  %v313_v30 = vsel %vm83_vm2, %v311_v28, %v309_v37 }
 0x318   :  { %v306_v31 = vmul.f32 %v738_v59, %v304_v27  ;;  %v307_v32 = vmul.f32 %v743_v60, %v305_v36  ;;  %v320_v35 = vadd.f32 %v755_v2, %v313_v30  ;;  %v321_v22 = vadd.f32 %v764_v6, %v312_v29 }
 0x319   :  { %v363_v59 = vstv %s502_s0 }
 0x31a   :  { %v317_v33 = vpop.permute.xlu1 %316  ;;  %v315_v44 = vpop.permute.xlu0 %314  ;;  %v368_v42 = vmul.f32 %v367_v38, %v306_v31  ;;  %v369_v60 = vmul.f32 %v367_v38, %v307_v32  ;;  %v364_v50 = vmul.f32 %v363_v59, %v898_v39  ;;  %v365_v3 = vmul.f32 %v363_v59, %v901_v40  ;;  %v505_v39 = vld [vmem:[%s1002_s3 + $0x4] sm:$0xf] }
 0x31b   :  { %v318_v45 = vsel %vm90_vm3, %v315_v44, %v317_v33  ;;  %v319_v34 = vsel %vm90_vm3, %v317_v33, %v315_v44  ;;  %v416_v40 = vrot.slane %v392_v56, 4  ;;  %v421_v57 = vrot.slane %v505_v39, 4 }
 0x31c   :  { %v322_v61 = vadd.f32 %v773_v14, %v318_v45  ;;  %v323_v41 = vadd.f32 %v778_v15, %v319_v34  ;;  %v370_v53 = vadd.f32 %v368_v42, %v364_v50  ;;  %v371_v2 = vadd.f32 %v369_v60, %v365_v3 }
 0x31e   :  { %v324_v43 = vmax.f32 %v320_v35, %v322_v61  ;;  %v325_v46 = vmax.f32 %v321_v22, %v323_v41  ;;  %v508_v35 = vld [vmem:[%s1003_s4] ss:$0 sm:$0xff] }
 0x320   :  { %v326_v48 = vmax.f32 %v284_v13, %v324_v43  ;;  %v327_v49 = vmax.f32 %v285_v12, %v325_v46 }
 0x322   :  { %v374_v54 = vmul.f32 %v373_v47, %v326_v48  ;;  %v375_v6 = vmul.f32 %v373_v47, %v327_v49 }
 0x324   :  { %v376_v7 = vadd.f32 %v374_v54, %v370_v53  ;;  %v377_v14 = vadd.f32 %v375_v6, %v371_v2 }
 0x326   :  { %v378_v15 = vadd.f32 %v376_v7, %v904_v51  ;;  %v379_v8 = vadd.f32 %v377_v14, %v907_v52  ;;  %v506_v51 = vld [vmem:[%s1002_s3 + $0x8] sm:$0xf] }
 0x327   :  { %v426_v17 = vrot.slane %v506_v51, 4 }
 0x328   :  { %v389_v55 = vadd.f32 %v379_v8, %v378_v15 }
 0x32a   :  { %390 = vadd.xlane.f32.xlu0 %v389_v55 }
 0x350   :  { %v382_v58 = vpop.xlane.xlu0 %381 }
 0x351   :  { %v393_v63 = vmul.f32 %v392_v56, %v382_v58  ;;  %v418_v52 = vmul.f32 %v416_v40, %v382_v58 }
 0x354   :  { %v388_v20 = vpop.xlane.xlu0 %387 }
 0x355   :  { %v385_v62 = vpop.xlane.xlu1 %384  ;;  %v401_v11 = vmul.f32 %v506_v51, %v388_v20  ;;  %v428_v18 = vmul.f32 %v426_v17, %v388_v20 }
 0x356   :  { %v397_v12 = vmul.f32 %v505_v39, %v385_v62  ;;  %v423_v13 = vmul.f32 %v421_v57, %v385_v62 }
 0x358   :  { %v398_v21 = vadd.f32 %v397_v12, %v393_v63  ;;  %v424_v9 = vadd.f32 %v423_v13, %v418_v52 }
 0x35a   :  { %v402_v1 = vadd.f32 %v401_v11, %v398_v21  ;;  %v429_v4 = vadd.f32 %v428_v18, %v424_v9 }
 0x3b3   :  { %v391_v0 = vpop.xlane.xlu0 %390 }
 0x3b4   :  { %v405_v5 = vmul.f32 %v507_v16, %v391_v0  ;;  %v433_v19 = vmul.f32 %v431_v10, %v391_v0 }
 0x3b6   :  { %v406_v23 = vadd.f32 %v405_v5, %v402_v1  ;;  %v434_v24 = vadd.f32 %v433_v19, %v429_v4 }
 0x3b8   :  { %v408_v25 = vsel %vm407_vm4, %v406_v23, 0.0  ;;  %v436_v26 = vrot.slane %v434_v24, 4 }
 0x3b9   :  { %v409_v27 = vrot.slane %v408_v25, 4 }
 0x3ba   :  { %v438_v36 = vsel %vm407_vm4, %v436_v26, 0.0 }
 0x3bb   :  { %v410_v28 = vadd.f32 %v409_v27, %v408_v25  ;;  %v439_v37 = vrot.slane %v438_v36, 4 }
 0x3bd   :  { %v411_v29 = vrot.slane %v410_v28, 2  ;;  %v440_v30 = vadd.f32 %v439_v37, %v438_v36 }
 0x3bf   :  { %v412_v31 = vadd.f32 %v411_v29, %v410_v28  ;;  %v441_v32 = vrot.slane %v440_v30, 2 }
 0x3c1   :  { %v442_v33 = vadd.f32 %v441_v32, %v440_v30  ;;  %v413_v44 = vrot.slane %v412_v31, 1 }
 0x3c3   :  { %v443_v38 = vrot.slane %v442_v33, 1  ;;  %v414_v45 = vadd.f32 %v413_v44, %v412_v31 }
 0x3c5   :  { %v444_v34 = vadd.f32 %v443_v38, %v442_v33 }
 0x3c7   :  { %v447_v22 = vsel %vm446_vm5, %v414_v45, %v444_v34 }
 0x3c8   :  { %v454_v61 = vadd.f32 %v508_v35, %v447_v22 }
 0x3ca   :  { %455 = vst [vmem:[#allocation5] sm:$0x3] %v454_v61 }
 0x3cb   :  { %538 = shalt.err (!%p535_p9)
}
 0x3cc   :  { %465 = dma.vmem_to_hbm [thread:$0]  %s463_s15, 32, %s1004_s5, [#allocation3]  }
 0x3cd   :  { %549 = dma.done.wait [#allocation3], 32  }
 0x3ce   :  { %550 = vsyncadd [#allocation3], 4294967264 }
 0x3cf   :  { %469 = vsyncpa [#allocation3], 1 }
 0x3d0   :  { %470 = vsyncpa [#allocation4], 1 }

</bundles_post_ra>
